<compile_context>
chip_gen: v7x
topology: tpu7x:2x2x1
jax: 0.10.0
libtpu: 0.0.40
codegen_flags: <defaults>
</compile_context>

<pallas_src>
import jax
import jax.numpy as jnp
from jax import lax
from jax.experimental import pallas as pl
from jax.experimental.pallas import tpu as pltpu

D = 3               # group.d
DIN = 2 * D         # rep_in.size()  (rep_in = 2*Vector)
DOUT = D            # rep_out.size() (rep_out = Vector)
CH = 384            # EMLP channel width (as in the module)
H2 = 32             # hidden width of the substituted self.model
LANE = 128


def _dot3(a, b):
    """Per-lane 3-vector dot product: (3, TB) x (3, TB) -> (1, TB)."""
    p = a * b
    return p[0:1, :] + p[1:2, :] + p[2:3, :]


def interface_kernel(xT_ref,
                     w1T_ref, b1_ref, w2T_ref, b2_ref,
                     w3T_ref, b3_ref, w4T_ref, b4_ref,
                     out_ref):
    # Layout: everything is (feature, batch) with batch on the lane axis, so all
    # the Gram-Schmidt / epilogue math runs with full lane occupancy and the
    # final store is lane-dense.
    xT = xT_ref[...]                                          # (DIN, TB)

    # ---- samples(): io(x + noise_scale * z) --------------------------------
    # noise offset is pre-folded into b1 by the wrapper.
    h = jnp.maximum(
        jnp.dot(w1T_ref[...], xT, preferred_element_type=jnp.float32)
        + b1_ref[...], 0.0)                                   # (CH, TB)
    out9 = (jnp.dot(w2T_ref[...], h, preferred_element_type=jnp.float32)
            + b2_ref[...])                                    # (9, TB)

    # W2's columns were permuted in the wrapper to [0,1,2, 1,4,7, 2,5,8], which
    # reproduces the torch code's view(B,3,3).permute(0,2,1) row/column mixing:
    #   u0 = column 0 of out_t -> rows 0:3, v1 = row 1 -> rows 3:6,
    #   v2 = row 2 -> rows 6:9   (all contiguous slices now).
    u0 = out9[0:3, :]
    v1 = out9[3:6, :]
    v2 = out9[6:9, :]

    d00 = _dot3(u0, u0)
    r00 = pl.reciprocal(d00, approx=True)                     # EUP slot
    u1 = v1 - (_dot3(u0, v1) * r00) * u0
    d11 = _dot3(u1, u1)
    u2 = (v2 - (_dot3(u0, v2) * r00) * u0
          - (_dot3(u1, v2) * pl.reciprocal(d11, approx=True)) * u1)

    u0 = u0 * lax.rsqrt(d00)
    u1 = u1 * lax.rsqrt(d11)
    u2 = u2 * lax.rsqrt(_dot3(u2, u2))
    # gs[b, :, k] = uk[:, b]   (columns of the sampled group element)

    # ---- symmetrized_model(): rho_in(gs) @ x = blockdiag(gs, gs) @ x,
    # immediately consumed by the model's first matmul (split over the two
    # 3-wide halves of W3^T so no (6, TB) concat is needed) --------------------
    def gs_apply(v3):                                         # gs @ v, v3: (3, TB)
        return u0 * v3[0:1, :] + u1 * v3[1:2, :] + u2 * v3[2:3, :]

    h2 = jnp.maximum(
        jnp.dot(w3T_ref[:, 0:3], gs_apply(xT[0:3, :]),
                preferred_element_type=jnp.float32)
        + jnp.dot(w3T_ref[:, 3:6], gs_apply(xT[3:6, :]),
                  preferred_element_type=jnp.float32)
        + b3_ref[...], 0.0)                                   # (H2, TB)
    m = (jnp.dot(w4T_ref[...], h2, preferred_element_type=jnp.float32)
         + b4_ref[...])                                       # (DOUT, TB)

    # ---- inv(rho_out(gs)) @ m ; gs orthonormal => inv(gs) = gs^T ------------
    out_ref[0:1, :] = _dot3(u0, m)
    out_ref[1:2, :] = _dot3(u1, m)
    out_ref[2:3, :] = _dot3(u2, m)


def interface_forward(x, params, n_samples, z):
    """x: (B0, DIN) f32 -> (B0, DOUT).

    z is a single (1, DIN) vector shared by all n_samples replicas (exactly as
    in the torch module, which draws one z per samples() call), so every sample
    is identical and the mean over samples is a no-op -> compute one sample.
    """
    del n_samples
    noise_scale, w1, b1, w2, b2, w3, b3, w4, b4 = params
    b0 = x.shape[0]

    # Fold the (single, shared) noise offset into the io bias:
    #   W1^T (x + c) + b1 = W1^T x + ((c @ W1) + b1),  c = noise_scale * z
    c = noise_scale * z                                       # (1, DIN)
    b1f = (b1 + jnp.dot(c, w1)).reshape(CH, 1)                # (CH, 1)

    # Permute W2's output columns to [0,1,2, 1,4,7, 2,5,8] so u0/v1/v2 are
    # contiguous sublane slices inside the kernel (free at trace time).
    cols = jnp.array([0, 1, 2, 1, 4, 7, 2, 5, 8])
    w2pT = w2[:, cols].T                                      # (9, CH)
    b2p = b2[:, cols].reshape(D * D, 1)                       # (9, 1)

    w1T, w3T, w4T = w1.T, w3.T, w4.T
    b3c, b4c = b3.reshape(H2, 1), b4.reshape(DOUT, 1)

    # Zero-pad the batch up to a lane multiple (no edge-mode gather); padded
    # lanes are per-lane independent and sliced off afterwards.
    bp = ((b0 + LANE - 1) // LANE) * LANE
    xT = jnp.pad(x, ((0, bp - b0), (0, 0))).T                 # (DIN, bp)

    # Tile selection: few, fat grid steps (amortize ~0.35us/step overhead); for
    # bp > 512 keep >= 2 "parallel" steps so v7x's two TensorCores both get work.
    if bp <= 512:
        tb = bp
    else:
        tb = LANE
        for cand in (1024, 512, 256):
            if bp % cand == 0 and bp // cand >= 2:
                tb = cand
                break

    full = lambda i: (0, 0)
    out = pl.pallas_call(
        interface_kernel,
        out_shape=jax.ShapeDtypeStruct((DOUT, bp), jnp.float32),
        grid_spec=pltpu.PrefetchScalarGridSpec(
            num_scalar_prefetch=0,
            grid=(bp // tb,),
            in_specs=[
                pl.BlockSpec((DIN, tb), lambda i: (0, i)),    # x^T (batch on lanes)
                pl.BlockSpec((CH, DIN), full),                # io W1^T
                pl.BlockSpec((CH, 1), full),                  # io b1 + W1^T(noise*z)
                pl.BlockSpec((D * D, CH), full),              # io W2^T (cols permuted)
                pl.BlockSpec((D * D, 1), full),               # io b2 (permuted)
                pl.BlockSpec((H2, DIN), full),                # model W1^T
                pl.BlockSpec((H2, 1), full),                  # model b1
                pl.BlockSpec((DOUT, H2), full),               # model W2^T
                pl.BlockSpec((DOUT, 1), full),                # model b2
            ],
            out_specs=pl.BlockSpec((DOUT, tb), lambda i: (0, i)),
        ),
        compiler_params=pltpu.CompilerParams(dimension_semantics=("parallel",)),
    )(xT, w1T, b1f, w2pT, b2p, w3T, b3c, w4T, b4c)

    return out[:, :b0].T                                      # (B0, DOUT)


# ---------------- pure-JAX reference (exact torch semantics) ----------------
def _proj(u, v):
    return (jnp.sum(v * u, axis=-1, keepdims=True)
            / jnp.sum(u * u, axis=-1, keepdims=True)) * u


def interface_reference(x, params, n_samples, z):
    noise_scale, w1, b1, w2, b2, w3, b3, w4, b4 = params
    hi = jax.lax.Precision.HIGHEST
    b0 = x.shape[0]
    xr = jnp.tile(x, (n_samples, 1))
    io_in = xr + noise_scale * z
    h = jnp.maximum(jnp.dot(io_in, w1, precision=hi) + b1, 0.0)
    out = (jnp.dot(h, w2, precision=hi) + b2).reshape(-1, D, D)
    out_t = jnp.transpose(out, (0, 2, 1))
    u0 = out_t[:, :, 0]
    v1 = out_t[:, 1, :]
    u1 = v1 - _proj(u0, v1)
    v2 = out_t[:, 2, :]
    u2 = v2 - _proj(u0, v2) - _proj(u1, v2)
    nrm = lambda u: u / jnp.linalg.norm(u, axis=-1, keepdims=True)
    gs = jnp.stack([nrm(u0), nrm(u1), nrm(u2)], axis=-1)      # (B, 3, 3)
    rho_in = jnp.zeros((xr.shape[0], DIN, DIN), jnp.float32)
    rho_in = rho_in.at[:, 0:3, 0:3].set(gs).at[:, 3:6, 3:6].set(gs)
    y = jnp.einsum('bij,bj->bi', rho_in, xr, precision=hi)
    h2 = jnp.maximum(jnp.dot(y, w3, precision=hi) + b3, 0.0)
    m = jnp.dot(h2, w4, precision=hi) + b4
    r = jnp.einsum('bij,bj->bi', jnp.linalg.inv(gs), m, precision=hi)
    return r.reshape(n_samples, b0, DOUT).mean(axis=0)


if __name__ == "__main__":
    key = jax.random.PRNGKey(0)
    kx, kz, k1, k2, k3, k4 = jax.random.split(key, 6)

    b0, n_samples = 8, 4
    x = jax.random.normal(kx, (b0, DIN), dtype=jnp.float32)
    z = jax.random.normal(kz, (1, DIN), dtype=jnp.float32)    # torch.randn(rep_in.size())

    noise_scale = jnp.ones((1, DIN), dtype=jnp.float32)       # nn.Parameter(torch.ones(...))
    w1 = jax.random.normal(k1, (DIN, CH), dtype=jnp.float32) / jnp.sqrt(DIN)
    b1 = jnp.zeros((1, CH), dtype=jnp.float32)
    w2 = jax.random.normal(k2, (CH, D * D), dtype=jnp.float32) / jnp.sqrt(CH)
    b2 = jnp.zeros((1, D * D), dtype=jnp.float32)
    w3 = jax.random.normal(k3, (DIN, H2), dtype=jnp.float32) / jnp.sqrt(DIN)
    b3 = jnp.zeros((1, H2), dtype=jnp.float32)
    w4 = jax.random.normal(k4, (H2, DOUT), dtype=jnp.float32) / jnp.sqrt(H2)
    b4 = jnp.zeros((1, DOUT), dtype=jnp.float32)
    params = (noise_scale, w1, b1, w2, b2, w3, b3, w4, b4)

    out = interface_forward(x, params, n_samples, z)
    out = jax.block_until_ready(out)

    ref = interface_reference(x, params, n_samples, z)
    err = float(jnp.max(jnp.abs(out - ref)))
    assert out.shape == (b0, DOUT)
    assert err < 5e-2, f"max abs error {err}"
    print("KERNEL_OK")
</pallas_src>

<mosaic_0001>
module attributes {stable_mosaic.version = 11 : i64} {
  func.func @interface_kernel(%arg0: i32, %arg1: memref<6x128xf32, #tpu.memory_space<vmem>>, %arg2: memref<384x6xf32, #tpu.memory_space<vmem>>, %arg3: memref<384x1xf32, #tpu.memory_space<vmem>>, %arg4: memref<9x384xf32, #tpu.memory_space<vmem>>, %arg5: memref<9x1xf32, #tpu.memory_space<vmem>>, %arg6: memref<32x6xf32, #tpu.memory_space<vmem>>, %arg7: memref<32x1xf32, #tpu.memory_space<vmem>>, %arg8: memref<3x32xf32, #tpu.memory_space<vmem>>, %arg9: memref<3x1xf32, #tpu.memory_space<vmem>>, %arg10: memref<3x128xf32, #tpu.memory_space<vmem>>) attributes {dimension_semantics = [#tpu.dimension_semantics<parallel>], iteration_bounds = array<i64: 1>, scalar_prefetch = 0 : i64, scratch_operands = 0 : i64, tpu.core_type = #tpu.core_type<tc>, window_params = [{transform_indices = @transform_0, window_bounds = array<i64: 6, 128>}, {pipeline_mode = #tpu.pipeline_mode<synchronous>, transform_indices = @transform_1, window_bounds = array<i64: 384, 6>}, {pipeline_mode = #tpu.pipeline_mode<synchronous>, transform_indices = @transform_2, window_bounds = array<i64: 384, 1>}, {pipeline_mode = #tpu.pipeline_mode<synchronous>, transform_indices = @transform_3, window_bounds = array<i64: 9, 384>}, {pipeline_mode = #tpu.pipeline_mode<synchronous>, transform_indices = @transform_4, window_bounds = array<i64: 9, 1>}, {pipeline_mode = #tpu.pipeline_mode<synchronous>, transform_indices = @transform_5, window_bounds = array<i64: 32, 6>}, {pipeline_mode = #tpu.pipeline_mode<synchronous>, transform_indices = @transform_6, window_bounds = array<i64: 32, 1>}, {pipeline_mode = #tpu.pipeline_mode<synchronous>, transform_indices = @transform_7, window_bounds = array<i64: 3, 32>}, {pipeline_mode = #tpu.pipeline_mode<synchronous>, transform_indices = @transform_8, window_bounds = array<i64: 3, 1>}, {transform_indices = @transform_9, window_bounds = array<i64: 3, 128>}]} {
    %c0 = arith.constant 0 : index
    %c0_0 = arith.constant 0 : index
    %0 = vector.load %arg1[%c0, %c0_0] : memref<6x128xf32, #tpu.memory_space<vmem>>, vector<6x128xf32>
    %c0_1 = arith.constant 0 : index
    %c0_2 = arith.constant 0 : index
    %1 = vector.load %arg2[%c0_1, %c0_2] : memref<384x6xf32, #tpu.memory_space<vmem>>, vector<384x6xf32>
    %cst = arith.constant dense<0.000000e+00> : vector<384x128xf32>
    %2 = tpu.matmul %1, %0, %cst {dimension_numbers = #tpu.dot_dimension_numbers<[1], [0], [0], [1], [0, 0, 1, 1], [], []>} : vector<384x6xf32>, vector<6x128xf32>, vector<384x128xf32> -> vector<384x128xf32>
    %c0_3 = arith.constant 0 : index
    %c0_4 = arith.constant 0 : index
    %3 = vector.load %arg3[%c0_3, %c0_4] : memref<384x1xf32, #tpu.memory_space<vmem>>, vector<384x1xf32>
    %4 = vector.broadcast %3 : vector<384x1xf32> to vector<384x128xf32>
    %5 = arith.addf %2, %4 : vector<384x128xf32>
    %cst_5 = arith.constant 0.000000e+00 : f32
    %6 = vector.broadcast %cst_5 : f32 to vector<384x128xf32>
    %7 = arith.maximumf %5, %6 : vector<384x128xf32>
    %c0_6 = arith.constant 0 : index
    %c0_7 = arith.constant 0 : index
    %8 = vector.load %arg4[%c0_6, %c0_7] : memref<9x384xf32, #tpu.memory_space<vmem>>, vector<9x384xf32>
    %cst_8 = arith.constant dense<0.000000e+00> : vector<9x128xf32>
    %9 = tpu.matmul %8, %7, %cst_8 {dimension_numbers = #tpu.dot_dimension_numbers<[1], [0], [0], [1], [0, 0, 1, 1], [], []>} : vector<9x384xf32>, vector<384x128xf32>, vector<9x128xf32> -> vector<9x128xf32>
    %c0_9 = arith.constant 0 : index
    %c0_10 = arith.constant 0 : index
    %10 = vector.load %arg5[%c0_9, %c0_10] : memref<9x1xf32, #tpu.memory_space<vmem>>, vector<9x1xf32>
    %11 = vector.broadcast %10 : vector<9x1xf32> to vector<9x128xf32>
    %12 = arith.addf %9, %11 : vector<9x128xf32>
    %13 = vector.extract_strided_slice %12 {offsets = [0, 0], sizes = [3, 128], strides = [1, 1]} : vector<9x128xf32> to vector<3x128xf32>
    %14 = vector.extract_strided_slice %12 {offsets = [3, 0], sizes = [3, 128], strides = [1, 1]} : vector<9x128xf32> to vector<3x128xf32>
    %15 = vector.extract_strided_slice %12 {offsets = [6, 0], sizes = [3, 128], strides = [1, 1]} : vector<9x128xf32> to vector<3x128xf32>
    %16 = arith.mulf %13, %13 : vector<3x128xf32>
    %17 = vector.extract_strided_slice %16 {offsets = [0, 0], sizes = [1, 128], strides = [1, 1]} : vector<3x128xf32> to vector<1x128xf32>
    %18 = vector.extract_strided_slice %16 {offsets = [1, 0], sizes = [1, 128], strides = [1, 1]} : vector<3x128xf32> to vector<1x128xf32>
    %19 = arith.addf %17, %18 : vector<1x128xf32>
    %20 = vector.extract_strided_slice %16 {offsets = [2, 0], sizes = [1, 128], strides = [1, 1]} : vector<3x128xf32> to vector<1x128xf32>
    %21 = arith.addf %19, %20 : vector<1x128xf32>
    %22 = tpu.reciprocal %21 {approx = true} : vector<1x128xf32> -> vector<1x128xf32>
    %23 = arith.mulf %13, %14 : vector<3x128xf32>
    %24 = vector.extract_strided_slice %23 {offsets = [0, 0], sizes = [1, 128], strides = [1, 1]} : vector<3x128xf32> to vector<1x128xf32>
    %25 = vector.extract_strided_slice %23 {offsets = [1, 0], sizes = [1, 128], strides = [1, 1]} : vector<3x128xf32> to vector<1x128xf32>
    %26 = arith.addf %24, %25 : vector<1x128xf32>
    %27 = vector.extract_strided_slice %23 {offsets = [2, 0], sizes = [1, 128], strides = [1, 1]} : vector<3x128xf32> to vector<1x128xf32>
    %28 = arith.addf %26, %27 : vector<1x128xf32>
    %29 = arith.mulf %28, %22 : vector<1x128xf32>
    %30 = vector.broadcast %29 : vector<1x128xf32> to vector<3x128xf32>
    %31 = arith.mulf %30, %13 : vector<3x128xf32>
    %32 = arith.subf %14, %31 : vector<3x128xf32>
    %33 = arith.mulf %32, %32 : vector<3x128xf32>
    %34 = vector.extract_strided_slice %33 {offsets = [0, 0], sizes = [1, 128], strides = [1, 1]} : vector<3x128xf32> to vector<1x128xf32>
    %35 = vector.extract_strided_slice %33 {offsets = [1, 0], sizes = [1, 128], strides = [1, 1]} : vector<3x128xf32> to vector<1x128xf32>
    %36 = arith.addf %34, %35 : vector<1x128xf32>
    %37 = vector.extract_strided_slice %33 {offsets = [2, 0], sizes = [1, 128], strides = [1, 1]} : vector<3x128xf32> to vector<1x128xf32>
    %38 = arith.addf %36, %37 : vector<1x128xf32>
    %39 = arith.mulf %13, %15 : vector<3x128xf32>
    %40 = vector.extract_strided_slice %39 {offsets = [0, 0], sizes = [1, 128], strides = [1, 1]} : vector<3x128xf32> to vector<1x128xf32>
    %41 = vector.extract_strided_slice %39 {offsets = [1, 0], sizes = [1, 128], strides = [1, 1]} : vector<3x128xf32> to vector<1x128xf32>
    %42 = arith.addf %40, %41 : vector<1x128xf32>
    %43 = vector.extract_strided_slice %39 {offsets = [2, 0], sizes = [1, 128], strides = [1, 1]} : vector<3x128xf32> to vector<1x128xf32>
    %44 = arith.addf %42, %43 : vector<1x128xf32>
    %45 = arith.mulf %44, %22 : vector<1x128xf32>
    %46 = vector.broadcast %45 : vector<1x128xf32> to vector<3x128xf32>
    %47 = arith.mulf %46, %13 : vector<3x128xf32>
    %48 = arith.subf %15, %47 : vector<3x128xf32>
    %49 = arith.mulf %32, %15 : vector<3x128xf32>
    %50 = vector.extract_strided_slice %49 {offsets = [0, 0], sizes = [1, 128], strides = [1, 1]} : vector<3x128xf32> to vector<1x128xf32>
    %51 = vector.extract_strided_slice %49 {offsets = [1, 0], sizes = [1, 128], strides = [1, 1]} : vector<3x128xf32> to vector<1x128xf32>
    %52 = arith.addf %50, %51 : vector<1x128xf32>
    %53 = vector.extract_strided_slice %49 {offsets = [2, 0], sizes = [1, 128], strides = [1, 1]} : vector<3x128xf32> to vector<1x128xf32>
    %54 = arith.addf %52, %53 : vector<1x128xf32>
    %55 = tpu.reciprocal %38 {approx = true} : vector<1x128xf32> -> vector<1x128xf32>
    %56 = arith.mulf %54, %55 : vector<1x128xf32>
    %57 = vector.broadcast %56 : vector<1x128xf32> to vector<3x128xf32>
    %58 = arith.mulf %57, %32 : vector<3x128xf32>
    %59 = arith.subf %48, %58 : vector<3x128xf32>
    %60 = math.rsqrt %21 : vector<1x128xf32>
    %61 = vector.broadcast %60 : vector<1x128xf32> to vector<3x128xf32>
    %62 = arith.mulf %13, %61 : vector<3x128xf32>
    %63 = math.rsqrt %38 : vector<1x128xf32>
    %64 = vector.broadcast %63 : vector<1x128xf32> to vector<3x128xf32>
    %65 = arith.mulf %32, %64 : vector<3x128xf32>
    %66 = arith.mulf %59, %59 : vector<3x128xf32>
    %67 = vector.extract_strided_slice %66 {offsets = [0, 0], sizes = [1, 128], strides = [1, 1]} : vector<3x128xf32> to vector<1x128xf32>
    %68 = vector.extract_strided_slice %66 {offsets = [1, 0], sizes = [1, 128], strides = [1, 1]} : vector<3x128xf32> to vector<1x128xf32>
    %69 = arith.addf %67, %68 : vector<1x128xf32>
    %70 = vector.extract_strided_slice %66 {offsets = [2, 0], sizes = [1, 128], strides = [1, 1]} : vector<3x128xf32> to vector<1x128xf32>
    %71 = arith.addf %69, %70 : vector<1x128xf32>
    %72 = math.rsqrt %71 : vector<1x128xf32>
    %73 = vector.broadcast %72 : vector<1x128xf32> to vector<3x128xf32>
    %74 = arith.mulf %59, %73 : vector<3x128xf32>
    %c0_11 = arith.constant 0 : index
    %c0_12 = arith.constant 0 : index
    %75 = vector.load %arg6[%c0_11, %c0_12] : memref<32x6xf32, #tpu.memory_space<vmem>>, vector<32x3xf32>
    %76 = vector.extract_strided_slice %0 {offsets = [0, 0], sizes = [3, 128], strides = [1, 1]} : vector<6x128xf32> to vector<3x128xf32>
    %77 = vector.extract_strided_slice %76 {offsets = [0, 0], sizes = [1, 128], strides = [1, 1]} : vector<3x128xf32> to vector<1x128xf32>
    %78 = vector.broadcast %77 : vector<1x128xf32> to vector<3x128xf32>
    %79 = arith.mulf %62, %78 : vector<3x128xf32>
    %80 = vector.extract_strided_slice %76 {offsets = [1, 0], sizes = [1, 128], strides = [1, 1]} : vector<3x128xf32> to vector<1x128xf32>
    %81 = vector.broadcast %80 : vector<1x128xf32> to vector<3x128xf32>
    %82 = arith.mulf %65, %81 : vector<3x128xf32>
    %83 = arith.addf %79, %82 : vector<3x128xf32>
    %84 = vector.extract_strided_slice %76 {offsets = [2, 0], sizes = [1, 128], strides = [1, 1]} : vector<3x128xf32> to vector<1x128xf32>
    %85 = vector.broadcast %84 : vector<1x128xf32> to vector<3x128xf32>
    %86 = arith.mulf %74, %85 : vector<3x128xf32>
    %87 = arith.addf %83, %86 : vector<3x128xf32>
    %cst_13 = arith.constant dense<0.000000e+00> : vector<32x128xf32>
    %88 = tpu.matmul %75, %87, %cst_13 {dimension_numbers = #tpu.dot_dimension_numbers<[1], [0], [0], [1], [0, 0, 1, 1], [], []>} : vector<32x3xf32>, vector<3x128xf32>, vector<32x128xf32> -> vector<32x128xf32>
    %c0_14 = arith.constant 0 : index
    %c3 = arith.constant 3 : index
    %89 = vector.load %arg6[%c0_14, %c3] : memref<32x6xf32, #tpu.memory_space<vmem>>, vector<32x3xf32>
    %90 = vector.extract_strided_slice %0 {offsets = [3, 0], sizes = [3, 128], strides = [1, 1]} : vector<6x128xf32> to vector<3x128xf32>
    %91 = vector.extract_strided_slice %90 {offsets = [0, 0], sizes = [1, 128], strides = [1, 1]} : vector<3x128xf32> to vector<1x128xf32>
    %92 = vector.broadcast %91 : vector<1x128xf32> to vector<3x128xf32>
    %93 = arith.mulf %62, %92 : vector<3x128xf32>
    %94 = vector.extract_strided_slice %90 {offsets = [1, 0], sizes = [1, 128], strides = [1, 1]} : vector<3x128xf32> to vector<1x128xf32>
    %95 = vector.broadcast %94 : vector<1x128xf32> to vector<3x128xf32>
    %96 = arith.mulf %65, %95 : vector<3x128xf32>
    %97 = arith.addf %93, %96 : vector<3x128xf32>
    %98 = vector.extract_strided_slice %90 {offsets = [2, 0], sizes = [1, 128], strides = [1, 1]} : vector<3x128xf32> to vector<1x128xf32>
    %99 = vector.broadcast %98 : vector<1x128xf32> to vector<3x128xf32>
    %100 = arith.mulf %74, %99 : vector<3x128xf32>
    %101 = arith.addf %97, %100 : vector<3x128xf32>
    %cst_15 = arith.constant dense<0.000000e+00> : vector<32x128xf32>
    %102 = tpu.matmul %89, %101, %cst_15 {dimension_numbers = #tpu.dot_dimension_numbers<[1], [0], [0], [1], [0, 0, 1, 1], [], []>} : vector<32x3xf32>, vector<3x128xf32>, vector<32x128xf32> -> vector<32x128xf32>
    %103 = arith.addf %88, %102 : vector<32x128xf32>
    %c0_16 = arith.constant 0 : index
    %c0_17 = arith.constant 0 : index
    %104 = vector.load %arg7[%c0_16, %c0_17] : memref<32x1xf32, #tpu.memory_space<vmem>>, vector<32x1xf32>
    %105 = vector.broadcast %104 : vector<32x1xf32> to vector<32x128xf32>
    %106 = arith.addf %103, %105 : vector<32x128xf32>
    %cst_18 = arith.constant 0.000000e+00 : f32
    %107 = vector.broadcast %cst_18 : f32 to vector<32x128xf32>
    %108 = arith.maximumf %106, %107 : vector<32x128xf32>
    %c0_19 = arith.constant 0 : index
    %c0_20 = arith.constant 0 : index
    %109 = vector.load %arg8[%c0_19, %c0_20] : memref<3x32xf32, #tpu.memory_space<vmem>>, vector<3x32xf32>
    %cst_21 = arith.constant dense<0.000000e+00> : vector<3x128xf32>
    %110 = tpu.matmul %109, %108, %cst_21 {dimension_numbers = #tpu.dot_dimension_numbers<[1], [0], [0], [1], [0, 0, 1, 1], [], []>} : vector<3x32xf32>, vector<32x128xf32>, vector<3x128xf32> -> vector<3x128xf32>
    %c0_22 = arith.constant 0 : index
    %c0_23 = arith.constant 0 : index
    %111 = vector.load %arg9[%c0_22, %c0_23] : memref<3x1xf32, #tpu.memory_space<vmem>>, vector<3x1xf32>
    %112 = vector.broadcast %111 : vector<3x1xf32> to vector<3x128xf32>
    %113 = arith.addf %110, %112 : vector<3x128xf32>
    %114 = arith.mulf %62, %113 : vector<3x128xf32>
    %115 = vector.extract_strided_slice %114 {offsets = [0, 0], sizes = [1, 128], strides = [1, 1]} : vector<3x128xf32> to vector<1x128xf32>
    %116 = vector.extract_strided_slice %114 {offsets = [1, 0], sizes = [1, 128], strides = [1, 1]} : vector<3x128xf32> to vector<1x128xf32>
    %117 = arith.addf %115, %116 : vector<1x128xf32>
    %118 = vector.extract_strided_slice %114 {offsets = [2, 0], sizes = [1, 128], strides = [1, 1]} : vector<3x128xf32> to vector<1x128xf32>
    %119 = arith.addf %117, %118 : vector<1x128xf32>
    %c0_24 = arith.constant 0 : index
    %c0_25 = arith.constant 0 : index
    %120 = vector.load %arg10[%c0_24, %c0_25] : memref<3x128xf32, #tpu.memory_space<vmem>>, vector<1x128xf32>
    tpu.vector_store %arg10[%c0_24, %c0_25], %119 {strides = array<i32>} : memref<3x128xf32, #tpu.memory_space<vmem>>, vector<1x128xf32>,
    %121 = arith.mulf %65, %113 : vector<3x128xf32>
    %122 = vector.extract_strided_slice %121 {offsets = [0, 0], sizes = [1, 128], strides = [1, 1]} : vector<3x128xf32> to vector<1x128xf32>
    %123 = vector.extract_strided_slice %121 {offsets = [1, 0], sizes = [1, 128], strides = [1, 1]} : vector<3x128xf32> to vector<1x128xf32>
    %124 = arith.addf %122, %123 : vector<1x128xf32>
    %125 = vector.extract_strided_slice %121 {offsets = [2, 0], sizes = [1, 128], strides = [1, 1]} : vector<3x128xf32> to vector<1x128xf32>
    %126 = arith.addf %124, %125 : vector<1x128xf32>
    %c1 = arith.constant 1 : index
    %c0_26 = arith.constant 0 : index
    %127 = vector.load %arg10[%c1, %c0_26] : memref<3x128xf32, #tpu.memory_space<vmem>>, vector<1x128xf32>
    tpu.vector_store %arg10[%c1, %c0_26], %126 {strides = array<i32>} : memref<3x128xf32, #tpu.memory_space<vmem>>, vector<1x128xf32>,
    %128 = arith.mulf %74, %113 : vector<3x128xf32>
    %129 = vector.extract_strided_slice %128 {offsets = [0, 0], sizes = [1, 128], strides = [1, 1]} : vector<3x128xf32> to vector<1x128xf32>
    %130 = vector.extract_strided_slice %128 {offsets = [1, 0], sizes = [1, 128], strides = [1, 1]} : vector<3x128xf32> to vector<1x128xf32>
    %131 = arith.addf %129, %130 : vector<1x128xf32>
    %132 = vector.extract_strided_slice %128 {offsets = [2, 0], sizes = [1, 128], strides = [1, 1]} : vector<3x128xf32> to vector<1x128xf32>
    %133 = arith.addf %131, %132 : vector<1x128xf32>
    %c2 = arith.constant 2 : index
    %c0_27 = arith.constant 0 : index
    %134 = vector.load %arg10[%c2, %c0_27] : memref<3x128xf32, #tpu.memory_space<vmem>>, vector<1x128xf32>
    tpu.vector_store %arg10[%c2, %c0_27], %133 {strides = array<i32>} : memref<3x128xf32, #tpu.memory_space<vmem>>, vector<1x128xf32>,
    return
  }
  func.func @transform_0(%arg0: i32) -> (i32, i32) {
    %c0_i32 = arith.constant 0 : i32
    %c0_i32_0 = arith.constant 0 : i32
    return %c0_i32, %arg0 : i32, i32
  }
  func.func @transform_1(%arg0: i32) -> (i32, i32) {
    %c0_i32 = arith.constant 0 : i32
    %c0_i32_0 = arith.constant 0 : i32
    %c0_i32_1 = arith.constant 0 : i32
    return %c0_i32, %c0_i32_0 : i32, i32
  }
  func.func @transform_2(%arg0: i32) -> (i32, i32) {
    %c0_i32 = arith.constant 0 : i32
    %c0_i32_0 = arith.constant 0 : i32
    %c0_i32_1 = arith.constant 0 : i32
    return %c0_i32, %c0_i32_0 : i32, i32
  }
  func.func @transform_3(%arg0: i32) -> (i32, i32) {
    %c0_i32 = arith.constant 0 : i32
    %c0_i32_0 = arith.constant 0 : i32
    %c0_i32_1 = arith.constant 0 : i32
    return %c0_i32, %c0_i32_0 : i32, i32
  }
  func.func @transform_4(%arg0: i32) -> (i32, i32) {
    %c0_i32 = arith.constant 0 : i32
    %c0_i32_0 = arith.constant 0 : i32
    %c0_i32_1 = arith.constant 0 : i32
    return %c0_i32, %c0_i32_0 : i32, i32
  }
  func.func @transform_5(%arg0: i32) -> (i32, i32) {
    %c0_i32 = arith.constant 0 : i32
    %c0_i32_0 = arith.constant 0 : i32
    %c0_i32_1 = arith.constant 0 : i32
    return %c0_i32, %c0_i32_0 : i32, i32
  }
  func.func @transform_6(%arg0: i32) -> (i32, i32) {
    %c0_i32 = arith.constant 0 : i32
    %c0_i32_0 = arith.constant 0 : i32
    %c0_i32_1 = arith.constant 0 : i32
    return %c0_i32, %c0_i32_0 : i32, i32
  }
  func.func @transform_7(%arg0: i32) -> (i32, i32) {
    %c0_i32 = arith.constant 0 : i32
    %c0_i32_0 = arith.constant 0 : i32
    %c0_i32_1 = arith.constant 0 : i32
    return %c0_i32, %c0_i32_0 : i32, i32
  }
  func.func @transform_8(%arg0: i32) -> (i32, i32) {
    %c0_i32 = arith.constant 0 : i32
    %c0_i32_0 = arith.constant 0 : i32
    %c0_i32_1 = arith.constant 0 : i32
    return %c0_i32, %c0_i32_0 : i32, i32
  }
  func.func @transform_9(%arg0: i32) -> (i32, i32) {
    %c0_i32 = arith.constant 0 : i32
    %c0_i32_0 = arith.constant 0 : i32
    return %c0_i32, %arg0 : i32, i32
  }
}

</mosaic_0001>

<bundles_post_ra>
// kernel: tpu_custom_call.1
= control target key start
LH: loop header
LB: loop body
LE: loop exit
PB: predicated region body
PF: predicated region fallthrough
CT: control target
= control target key end

     0   :  { %vm515_vm0 = vcmask 1045504   ;;  %v2014_v3 = vmov 0   ;;  %vm370_vm1 = vcmask 48128   ;;  %s2625_s0 = inlined_call_operand.vmem [shape: f32[6,128], index: 0, kind: input, shape index: {}]   ;;  %s2626_s1 = inlined_call_operand.vmem [shape: f32[384,6], index: 1, kind: input, shape index: {}]   ;;  %s2627_s2 = inlined_call_operand.vmem [shape: f32[384,1], index: 2, kind: input, shape index: {}]   ;;  %s2628_s3 = inlined_call_operand.vmem [shape: f32[9,384], index: 3, kind: input, shape index: {}]   ;;  %s2629_s4 = inlined_call_operand.vmem [shape: f32[9,1], index: 4, kind: input, shape index: {}]   ;;  %s2630_s5 = inlined_call_operand.vmem [shape: f32[32,6], index: 5, kind: input, shape index: {}]   ;;  %s2631_s6 = inlined_call_operand.vmem [shape: f32[32,1], index: 6, kind: input, shape index: {}]   ;;  %s2632_s7 = inlined_call_operand.vmem [shape: f32[3,32], index: 7, kind: input, shape index: {}]   ;;  %s2633_s8 = inlined_call_operand.vmem [shape: f32[3,1], index: 8, kind: input, shape index: {}]   ;;  %s2634_s9 = inlined_call_operand.hbm [shape: f32[3,128], index: 9, kind: output, shape index: {}]  }
   0x1   :  { %v33_v0 = vld [vmem:[%s2625_s0] sm:$0x3f]  ;;  %1978 = vset.pattern.permute.xlu1 %v2014_v3  ;;  %1977 = vset.pattern.permute.xlu0 %v2014_v3  ;;  %v35_v5 = vld [vmem:[%s2626_s1 + $0x8] sm:$0xff]  ;;  %v36_v7 = vld [vmem:[%s2626_s1 + $0x10] sm:$0xff] }
   0x2   :  { %v98_v1 = vld [vmem:[%s2627_s2 + $0x80] sm:$0xff]  ;;  %1761 = vmatprep.subr.msk.mxu0 %vm515_vm0, %v33_v0  ;;  %v99_v6 = vld [vmem:[%s2627_s2 + $0x88] sm:$0xff]  ;;  %v37_v9 = vld [vmem:[%s2626_s1 + $0x18] sm:$0xff] }
   0x3   :  { %v82_v2 = vld [vmem:[%s2627_s2] sm:$0xff]  ;;  %212 = vperm.xlu0 %1977, %v98_v1   ;;  %1762 = vmatpush3.msk.msra.mxu0 %vm515_vm0, %v33_v0  ;;  %v83_v8 = vld [vmem:[%s2627_s2 + $0x8] sm:$0xff]  ;;  %v100_v10 = vld [vmem:[%s2627_s2 + $0x90] sm:$0xff] }
   0x4   :  { %v34_v4 = vld [vmem:[%s2626_s1] sm:$0xff]  ;;  %132 = vperm.xlu1 %1978, %v82_v2   ;;  %v101_v12 = vld [vmem:[%s2627_s2 + $0x98] sm:$0xff]  ;;  %v39_v13 = vld [vmem:[%s2626_s1 + $0x28] sm:$0xff] }
   0x5   :  { %1763 = vmatprep.mubr.msk.f32.mxu0 %vm370_vm1, %v34_v4  ;;  %v38_v11 = vld [vmem:[%s2626_s1 + $0x20] sm:$0xff]  ;;  %v84_v14 = vld [vmem:[%s2627_s2 + $0x10] sm:$0xff]  ;;  %v85_v16 = vld [vmem:[%s2627_s2 + $0x18] sm:$0xff] }
   0x6   :  { %1764 = vmatmul.mubr.msk.f32.vlgmr.msra.gmra.mrb[0].mxu0 %vm370_vm1, %v35_v5  ;;  %v40_v15 = vld [vmem:[%s2626_s1 + $0x30] sm:$0xff]  ;;  %v41_v17 = vld [vmem:[%s2626_s1 + $0x38] sm:$0xff]  ;;  %v102_v18 = vld [vmem:[%s2627_s2 + $0xa0] sm:$0xff] }
   0x7   :  { %217 = vperm.xlu0 %1977, %v99_v6   ;;  %1766 = vmatprep.mubr.msk.f32.mxu0 %vm370_vm1, %v36_v7  ;;  %v42_v19 = vld [vmem:[%s2626_s1 + $0x40] sm:$0xff]  ;;  %v103_v20 = vld [vmem:[%s2627_s2 + $0xa8] sm:$0xff]  ;;  %v44_v23 = vld [vmem:[%s2626_s1 + $0x50] sm:$0xff] }
   0x8   :  { %137 = vperm.xlu1 %1978, %v83_v8   ;;  %v43_v21 = vld [vmem:[%s2626_s1 + $0x48] sm:$0xff]  ;;  %v86_v22 = vld [vmem:[%s2627_s2 + $0x20] sm:$0xff]  ;;  %v45_v25 = vld [vmem:[%s2626_s1 + $0x58] sm:$0xff] }
   0x9   :  { %v87_v24 = vld [vmem:[%s2627_s2 + $0x28] sm:$0xff]  ;;  %v104_v26 = vld [vmem:[%s2627_s2 + $0xb0] sm:$0xff]  ;;  %v46_v27 = vld [vmem:[%s2626_s1 + $0x60] sm:$0xff] }
   0xa   :  { %1767 = vmatmul.mubr.msk.f32.gmra.mrb[2].mxu0 %vm370_vm1, %v37_v9  ;;  %v105_v28 = vld [vmem:[%s2627_s2 + $0xb8] sm:$0xff]  ;;  %v47_v29 = vld [vmem:[%s2626_s1 + $0x68] sm:$0xff]  ;;  %v88_v30 = vld [vmem:[%s2627_s2 + $0x30] sm:$0xff] }
   0xb   :  { %222 = vperm.xlu0 %1977, %v100_v10   ;;  %1769 = vmatprep.mubr.msk.f32.mxu0 %vm370_vm1, %v38_v11  ;;  %v48_v31 = vld [vmem:[%s2626_s1 + $0x70] sm:$0xff]  ;;  %v89_v32 = vld [vmem:[%s2627_s2 + $0x38] sm:$0xff]  ;;  %v106_v34 = vld [vmem:[%s2627_s2 + $0xc0] sm:$0xff] }
   0xc   :  { %227 = vperm.xlu1 %1978, %v101_v12   ;;  %v49_v33 = vld [vmem:[%s2626_s1 + $0x78] sm:$0xff]  ;;  %v50_v35 = vld [vmem:[%s2626_s1 + $0x80] sm:$0xff]  ;;  %v107_v36 = vld [vmem:[%s2627_s2 + $0xc8] sm:$0xff] }
   0xd   :  { %v51_v37 = vld [vmem:[%s2626_s1 + $0x88] sm:$0xff]  ;;  %v90_v38 = vld [vmem:[%s2627_s2 + $0x40] sm:$0xff]  ;;  %v52_v39 = vld [vmem:[%s2626_s1 + $0x90] sm:$0xff] }
   0xe   :  { %1770 = vmatmul.mubr.msk.f32.gmra.mrb[4].mxu0 %vm370_vm1, %v39_v13  ;;  %v91_v40 = vld [vmem:[%s2627_s2 + $0x48] sm:$0xff] }
   0xf   :  { %142 = vperm.xlu0 %1977, %v84_v14   ;;  %1772 = vmatprep.mubr.msk.f32.mxu0 %vm370_vm1, %v40_v15 }
  0x10   :  { %147 = vperm.xlu1 %1978, %v85_v16  }
  0x12   :  { %1773 = vmatmul.mubr.msk.f32.gmra.mrb[6].mxu0 %vm370_vm1, %v41_v17 }
  0x13   :  { %232 = vperm.xlu0 %1977, %v102_v18   ;;  %1775 = vmatprep.mubr.msk.f32.mxu0 %vm370_vm1, %v42_v19 }
  0x14   :  { %237 = vperm.xlu1 %1978, %v103_v20  }
  0x16   :  { %1776 = vmatmul.mubr.msk.f32.gmra.mrb[8].mxu0 %vm370_vm1, %v43_v21 }
  0x17   :  { %152 = vperm.xlu0 %1977, %v86_v22   ;;  %1778 = vmatprep.mubr.msk.f32.mxu0 %vm370_vm1, %v44_v23 }
  0x18   :  { %157 = vperm.xlu1 %1978, %v87_v24  }
  0x1a   :  { %1779 = vmatmul.mubr.msk.f32.gmra.mrb[10].mxu0 %vm370_vm1, %v45_v25 }
  0x1b   :  { %242 = vperm.xlu0 %1977, %v104_v26   ;;  %1781 = vmatprep.mubr.msk.f32.mxu0 %vm370_vm1, %v46_v27 }
  0x1c   :  { %247 = vperm.xlu1 %1978, %v105_v28  }
  0x1e   :  { %1782 = vmatmul.mubr.msk.f32.gmra.mrb[12].mxu0 %vm370_vm1, %v47_v29 }
  0x1f   :  { %162 = vperm.xlu0 %1977, %v88_v30   ;;  %1784 = vmatprep.mubr.msk.f32.mxu0 %vm370_vm1, %v48_v31 }
  0x20   :  { %167 = vperm.xlu1 %1978, %v89_v32  }
  0x22   :  { %1785 = vmatmul.mubr.msk.f32.gmra.mrb[14].mxu0 %vm370_vm1, %v49_v33 }
  0x23   :  { %252 = vperm.xlu0 %1977, %v106_v34   ;;  %1787 = vmatprep.mubr.msk.f32.mxu0 %vm370_vm1, %v50_v35 }
  0x24   :  { %257 = vperm.xlu1 %1978, %v107_v36  }
  0x25   :  { %14 = vsyncpa [#allocation3], 0  ;;  %v53_v41 = vld [vmem:[%s2626_s1 + $0x98] sm:$0xff]  ;;  %v108_v42 = vld [vmem:[%s2627_s2 + $0xd0] sm:$0xff]  ;;  %s2015_s20 = smov 125   ;;  %vm1226_vm2 = vcmask 23552  }
  0x26   :  { %1788 = vmatmul.mubr.msk.f32.gmra.mrb[16].mxu0 %vm370_vm1, %v51_v37  ;;  %v54_v43 = vld [vmem:[%s2626_s1 + $0xa0] sm:$0xff]  ;;  %v109_v44 = vld [vmem:[%s2627_s2 + $0xd8] sm:$0xff]  ;;  %v55_v45 = vld [vmem:[%s2626_s1 + $0xa8] sm:$0xff]  ;;  %vm1079_vm3 = vcmask 1041408   ;;  %vm1103_vm4 = vcmask 1044480   ;;  %vm1235_vm5 = vcmask 1042432  }
  0x27   :  { %172 = vperm.xlu0 %1977, %v90_v38   ;;  %1790 = vmatprep.mubr.msk.f32.mxu0 %vm370_vm1, %v52_v39  ;;  %v92_v46 = vld [vmem:[%s2627_s2 + $0x50] sm:$0xff]  ;;  %v93_v48 = vld [vmem:[%s2627_s2 + $0x58] sm:$0xff]  ;;  %v110_v50 = vld [vmem:[%s2627_s2 + $0xe0] sm:$0xff]  ;;  %vm2017_vm6 = vmmov 0   ;;  %vm1459_vm7 = vcmask 261120  }
  0x28   :  { %177 = vperm.xlu1 %1978, %v91_v40   ;;  %v56_v47 = vld [vmem:[%s2626_s1 + $0xb0] sm:$0xff]  ;;  %v57_v49 = vld [vmem:[%s2626_s1 + $0xb8] sm:$0xff]  ;;  %v58_v51 = vld [vmem:[%s2626_s1 + $0xc0] sm:$0xff] }
  0x29   :  { %v111_v52 = vld [vmem:[%s2627_s2 + $0xe8] sm:$0xff]  ;;  %v94_v54 = vld [vmem:[%s2627_s2 + $0x60] sm:$0xff]  ;;  %v60_v55 = vld [vmem:[%s2626_s1 + $0xd0] sm:$0xff] }
  0x2a   :  { %1791 = vmatmul.mubr.msk.f32.gmra.mrb[18].mxu0 %vm370_vm1, %v53_v41  ;;  %v59_v53 = vld [vmem:[%s2626_s1 + $0xc8] sm:$0xff]  ;;  %v61_v57 = vld [vmem:[%s2626_s1 + $0xd8] sm:$0xff]  ;;  %v112_v58 = vld [vmem:[%s2627_s2 + $0xf0] sm:$0xff] }
  0x2b   :  { %262 = vperm.xlu0 %1977, %v108_v42   ;;  %1793 = vmatprep.mubr.msk.f32.mxu0 %vm370_vm1, %v54_v43  ;;  %v95_v56 = vld [vmem:[%s2627_s2 + $0x68] sm:$0xff]  ;;  %v62_v59 = vld [vmem:[%s2626_s1 + $0xe0] sm:$0xff]  ;;  %v113_v60 = vld [vmem:[%s2627_s2 + $0xf8] sm:$0xff] }
  0x2c   :  { %267 = vperm.xlu1 %1978, %v109_v44   ;;  %v63_v61 = vld [vmem:[%s2626_s1 + $0xe8] sm:$0xff]  ;;  %v96_v62 = vld [vmem:[%s2627_s2 + $0x70] sm:$0xff]  ;;  %v97_v0 = vld [vmem:[%s2627_s2 + $0x78] sm:$0xff] }
  0x2d   :  { %v64_v63 = vld [vmem:[%s2626_s1 + $0xf0] sm:$0xff]  ;;  %v65_v1 = vld [vmem:[%s2626_s1 + $0xf8] sm:$0xff]  ;;  %v114_v2 = vld [vmem:[%s2627_s2 + $0x100] sm:$0xff] }
  0x2e   :  { %1794 = vmatmul.mubr.msk.f32.gmra.mrb[20].mxu0 %vm370_vm1, %v55_v45  ;;  %v66_v3 = vld [vmem:[%s2626_s1 + $0x100] sm:$0xff]  ;;  %v115_v4 = vld [vmem:[%s2627_s2 + $0x108] sm:$0xff]  ;;  %v116_v6 = vld [vmem:[%s2627_s2 + $0x110] sm:$0xff] }
  0x2f   :  { %182 = vperm.xlu0 %1977, %v92_v46   ;;  %1796 = vmatprep.mubr.msk.f32.mxu0 %vm370_vm1, %v56_v47  ;;  %v67_v5 = vld [vmem:[%s2626_s1 + $0x108] sm:$0xff]  ;;  %v68_v7 = vld [vmem:[%s2626_s1 + $0x110] sm:$0xff]  ;;  %v117_v8 = vld [vmem:[%s2627_s2 + $0x118] sm:$0xff] }
  0x30   :  { %187 = vperm.xlu1 %1978, %v93_v48   ;;  %v69_v9 = vld [vmem:[%s2626_s1 + $0x118] sm:$0xff]  ;;  %v118_v10 = vld [vmem:[%s2627_s2 + $0x120] sm:$0xff]  ;;  %v119_v12 = vld [vmem:[%s2627_s2 + $0x128] sm:$0xff] }
  0x31   :  { %v70_v11 = vld [vmem:[%s2626_s1 + $0x120] sm:$0xff]  ;;  %v71_v13 = vld [vmem:[%s2626_s1 + $0x128] sm:$0xff]  ;;  %v120_v14 = vld [vmem:[%s2627_s2 + $0x130] sm:$0xff] }
  0x32   :  { %1797 = vmatmul.mubr.msk.f32.gmra.mrb[22].mxu0 %vm370_vm1, %v57_v49  ;;  %v72_v15 = vld [vmem:[%s2626_s1 + $0x130] sm:$0xff]  ;;  %v121_v16 = vld [vmem:[%s2627_s2 + $0x138] sm:$0xff]  ;;  %v122_v18 = vld [vmem:[%s2627_s2 + $0x140] sm:$0xff] }
  0x33   :  { %272 = vperm.xlu0 %1977, %v110_v50   ;;  %1799 = vmatprep.mubr.msk.f32.mxu0 %vm370_vm1, %v58_v51  ;;  %v73_v17 = vld [vmem:[%s2626_s1 + $0x138] sm:$0xff]  ;;  %v74_v19 = vld [vmem:[%s2626_s1 + $0x140] sm:$0xff]  ;;  %v123_v20 = vld [vmem:[%s2627_s2 + $0x148] sm:$0xff] }
  0x34   :  { %277 = vperm.xlu1 %1978, %v111_v52   ;;  %v75_v21 = vld [vmem:[%s2626_s1 + $0x148] sm:$0xff]  ;;  %v124_v22 = vld [vmem:[%s2627_s2 + $0x150] sm:$0xff]  ;;  %v125_v24 = vld [vmem:[%s2627_s2 + $0x158] sm:$0xff] }
  0x35   :  { %v76_v23 = vld [vmem:[%s2626_s1 + $0x150] sm:$0xff]  ;;  %v77_v25 = vld [vmem:[%s2626_s1 + $0x158] sm:$0xff]  ;;  %v126_v26 = vld [vmem:[%s2627_s2 + $0x160] sm:$0xff] }
  0x36   :  { %1800 = vmatmul.mubr.msk.f32.gmra.mrb[24].mxu0 %vm370_vm1, %v59_v53  ;;  %v78_v27 = vld [vmem:[%s2626_s1 + $0x160] sm:$0xff]  ;;  %v127_v28 = vld [vmem:[%s2627_s2 + $0x168] sm:$0xff]  ;;  %v128_v30 = vld [vmem:[%s2627_s2 + $0x170] sm:$0xff] }
  0x37   :  { %192 = vperm.xlu0 %1977, %v94_v54   ;;  %1802 = vmatprep.mubr.msk.f32.mxu0 %vm370_vm1, %v60_v55  ;;  %v79_v29 = vld [vmem:[%s2626_s1 + $0x168] sm:$0xff]  ;;  %v80_v31 = vld [vmem:[%s2626_s1 + $0x170] sm:$0xff]  ;;  %v129_v32 = vld [vmem:[%s2627_s2 + $0x178] sm:$0xff] }
  0x38   :  { %197 = vperm.xlu1 %1978, %v95_v56   ;;  %v81_v33 = vld [vmem:[%s2626_s1 + $0x178] sm:$0xff]  ;;  %v878_v34 = vld [vmem:[%s2629_s4] sm:$0xff]  ;;  %v879_v35 = vld [vmem:[%s2629_s4 + $0x8] sm:$0x1] }
  0x39   :  { %v2418_v36 = vld [vmem:[%s2630_s5] sm:$0xff]  ;;  %v2423_v37 = vld [vmem:[%s2630_s5 + $0x8] sm:$0xff]  ;;  %v2430_v38 = vld [vmem:[%s2630_s5 + $0x10] sm:$0xff] }
  0x3a   :  { %1803 = vmatmul.mubr.msk.f32.gmra.mrb[26].mxu0 %vm370_vm1, %v61_v57  ;;  %v2435_v39 = vld [vmem:[%s2630_s5 + $0x18] sm:$0xff]  ;;  %v1420_v40 = vld [vmem:[%s2631_s6] sm:$0xff]  ;;  %v1421_v41 = vld [vmem:[%s2631_s6 + $0x8] sm:$0xff] }
  0x3b   :  { %282 = vperm.xlu0 %1977, %v112_v58   ;;  %1805 = vmatprep.mubr.msk.f32.mxu0 %vm370_vm1, %v62_v59  ;;  %v1422_v42 = vld [vmem:[%s2631_s6 + $0x10] sm:$0xff]  ;;  %v1423_v43 = vld [vmem:[%s2631_s6 + $0x18] sm:$0xff]  ;;  %v1453_v44 = vld [vmem:[%s2633_s8] sm:$0x7] }
  0x3c   :  { %287 = vperm.xlu1 %1978, %v113_v60   ;;  %v873_v47 = vld [vmem:[%s2628_s3 + $0x8] sm:$0xff] }
  0x3d   :  { %954 = vmatprep.mubr.f32.mxu1 %v873_v47 }
  0x3e   :  { %1806 = vmatmul.mubr.msk.f32.gmra.mrb[28].mxu0 %vm370_vm1, %v63_v61 }
  0x3f   :  { %202 = vperm.xlu0 %1977, %v96_v62   ;;  %1808 = vmatprep.mubr.msk.f32.mxu0 %vm370_vm1, %v64_v63 }
  0x40   :  { %207 = vperm.xlu1 %1978, %v97_v0  }
  0x42   :  { %1809 = vmatmul.mubr.msk.f32.gmra.mrb[30].mxu0 %vm370_vm1, %v65_v1 }
  0x43   :  { %292 = vperm.xlu0 %1977, %v114_v2   ;;  %1811 = vmatprep.mubr.msk.f32.mxu0 %vm370_vm1, %v66_v3 }
  0x44   :  { %297 = vperm.xlu1 %1978, %v115_v4  }
  0x46   :  { %1812 = vmatmul.mubr.msk.f32.gmra.mrb[32].mxu0 %vm370_vm1, %v67_v5 }
  0x47   :  { %302 = vperm.xlu0 %1977, %v116_v6   ;;  %1814 = vmatprep.mubr.msk.f32.mxu0 %vm370_vm1, %v68_v7 }
  0x48   :  { %307 = vperm.xlu1 %1978, %v117_v8  }
  0x4a   :  { %1815 = vmatmul.mubr.msk.f32.gmra.mrb[34].mxu0 %vm370_vm1, %v69_v9 }
  0x4b   :  { %312 = vperm.xlu0 %1977, %v118_v10   ;;  %1817 = vmatprep.mubr.msk.f32.mxu0 %vm370_vm1, %v70_v11 }
  0x4c   :  { %317 = vperm.xlu1 %1978, %v119_v12  }
  0x4e   :  { %1818 = vmatmul.mubr.msk.f32.gmra.mrb[36].mxu0 %vm370_vm1, %v71_v13 }
  0x4f   :  { %322 = vperm.xlu0 %1977, %v120_v14   ;;  %1820 = vmatprep.mubr.msk.f32.mxu0 %vm370_vm1, %v72_v15 }
  0x50   :  { %327 = vperm.xlu1 %1978, %v121_v16  }
  0x52   :  { %1821 = vmatmul.mubr.msk.f32.gmra.mrb[38].mxu0 %vm370_vm1, %v73_v17 }
  0x53   :  { %332 = vperm.xlu0 %1977, %v122_v18   ;;  %1823 = vmatprep.mubr.msk.f32.mxu0 %vm370_vm1, %v74_v19 }
  0x54   :  { %337 = vperm.xlu1 %1978, %v123_v20  }
  0x56   :  { %1824 = vmatmul.mubr.msk.f32.gmra.mrb[40].mxu0 %vm370_vm1, %v75_v21 }
  0x57   :  { %342 = vperm.xlu0 %1977, %v124_v22   ;;  %1826 = vmatprep.mubr.msk.f32.mxu0 %vm370_vm1, %v76_v23 }
  0x58   :  { %347 = vperm.xlu1 %1978, %v125_v24  }
  0x5a   :  { %1827 = vmatmul.mubr.msk.f32.gmra.mrb[42].mxu0 %vm370_vm1, %v77_v25 }
  0x5b   :  { %352 = vperm.xlu0 %1977, %v126_v26   ;;  %1829 = vmatprep.mubr.msk.f32.mxu0 %vm370_vm1, %v78_v27 }
  0x5c   :  { %357 = vperm.xlu1 %1978, %v127_v28  }
  0x5e   :  { %1830 = vmatmul.mubr.msk.f32.gmra.mrb[44].mxu0 %vm370_vm1, %v79_v29 }
  0x5f   :  { %362 = vperm.xlu0 %1977, %v128_v30   ;;  %1832 = vmatprep.mubr.msk.f32.mxu0 %vm370_vm1, %v80_v31 }
  0x60   :  { %367 = vperm.xlu1 %1978, %v129_v32  }
  0x62   :  { %1833 = vmatmul.mubr.msk.f32.gmra.mrb[46].mxu0 %vm370_vm1, %v81_v33 }
  0x63   :  { %882 = vperm.xlu0 %1977, %v878_v34  }
  0x64   :  { %887 = vperm.xlu1 %1978, %v879_v35  }
  0x67   :  { %1218 = vrot.lane.b32.xlu0 %v2418_v36, %s2015_s20 }
  0x68   :  { %1220 = vrot.lane.b32.xlu1 %v2423_v37, %s2015_s20 }
  0x6b   :  { %1222 = vrot.lane.b32.xlu0 %v2430_v38, %s2015_s20 }
  0x6c   :  { %1224 = vrot.lane.b32.xlu1 %v2435_v39, %s2015_s20 }
  0x6f   :  { %1426 = vperm.xlu0 %1977, %v1420_v40  }
  0x70   :  { %1431 = vperm.xlu1 %1978, %v1421_v41  }
  0x73   :  { %1436 = vperm.xlu0 %1977, %v1422_v42  }
  0x74   :  { %1441 = vperm.xlu1 %1978, %v1423_v43  }
  0x77   :  { %1456 = vperm.xlu0 %1977, %v1453_v44  }
  0x82   :  { %v2454_v46 = vpop.permute.xlu0 %212 }
  0x83   :  { %v133_v45 = vpop.permute.xlu1 %132 }
  0x86   :  { %v2459_v49 = vpop.permute.xlu0 %217 }
  0x87   :  { %v138_v48 = vpop.permute.xlu1 %137 }
  0x8a   :  { %v2463_v51 = vpop.permute.xlu0 %222 }
  0x8b   :  { %v2461_v50 = vpop.permute.xlu1 %227 }
  0x8e   :  { %v143_v53 = vpop.permute.xlu0 %142 }
  0x8f   :  { %v148_v52 = vpop.permute.xlu1 %147 }
  0x92   :  { %v2467_v55 = vpop.permute.xlu0 %232 }
  0x93   :  { %v2465_v54 = vpop.permute.xlu1 %237 }
  0x96   :  { %v153_v57 = vpop.permute.xlu0 %152 }
  0x97   :  { %v158_v56 = vpop.permute.xlu1 %157 }
  0x9a   :  { %v2471_v59 = vpop.permute.xlu0 %242 }
  0x9b   :  { %v2469_v58 = vpop.permute.xlu1 %247 }
  0x9e   :  { %v163_v61 = vpop.permute.xlu0 %162 }
  0x9f   :  { %v168_v60 = vpop.permute.xlu1 %167 }
  0xa2   :  { %v2475_v63 = vpop.permute.xlu0 %252 }
  0xa3   :  { %v2473_v62 = vpop.permute.xlu1 %257 }
  0xa6   :  { %v173_v1 = vpop.permute.xlu0 %172 }
  0xa7   :  { %v178_v0 = vpop.permute.xlu1 %177 }
  0xaa   :  { %v2479_v3 = vpop.permute.xlu0 %262 }
  0xab   :  { %v2477_v2 = vpop.permute.xlu1 %267 }
  0xae   :  { %v183_v12 = vpop.permute.xlu0 %182 }
  0xaf   :  { %v188_v9 = vpop.permute.xlu1 %187 }
  0xb2   :  { %v2487_v25 = vpop.permute.xlu0 %272 }
  0xb3   :  { %v2483_v22 = vpop.permute.xlu1 %277 }
  0xb6   :  { %v193_v41 = vpop.permute.xlu0 %192 }
  0xb7   :  { %v198_v34 = vpop.permute.xlu1 %197 }
  0xd9   :  { %v1765_v4 = vpop.f32.mrb[0].mxu0 }
  0xda   :  { %v591_v5 = vadd.f32 %v1765_v4, %v138_v48  ;;  %v585_v6 = vpop.f32.mrb[1].mxu0  ;;  %v2497_v4 = vpop.permute.xlu0 %282 }
  0xdb   :  { %v586_v7 = vadd.f32 %v585_v6, %v133_v45 }
  0xdc   :  { %v825_v8 = vmax.f32 %v591_v5, 0.0 }
  0xdd   :  { %v824_v10 = vmax.f32 %v586_v7, 0.0  ;;  %v1768_v11 = vpop.f32.mrb[2].mxu0 }
  0xde   :  { %v601_v13 = vadd.f32 %v1768_v11, %v148_v52  ;;  %v595_v14 = vpop.f32.mrb[3].mxu0 }
  0xdf   :  { %v596_v15 = vadd.f32 %v595_v14, %v143_v53  ;;  %v2481_v16 = vpack.c.bf16 %v825_v8, %v824_v10 }
  0xe0   :  { %v827_v17 = vmax.f32 %v601_v13, 0.0 }
  0xe1   :  { %v826_v18 = vmax.f32 %v596_v15, 0.0  ;;  %v1771_v19 = vpop.f32.mrb[4].mxu0  ;;  %v203_v15 = vpop.permute.xlu0 %202 }
  0xe2   :  { %v611_v20 = vadd.f32 %v1771_v19, %v158_v56  ;;  %v605_v21 = vpop.f32.mrb[5].mxu0 }
  0xe3   :  { %v2485_v23 = vpack.c.bf16 %v827_v17, %v826_v18  ;;  %v606_v24 = vadd.f32 %v605_v21, %v153_v57  ;;  %v2493_v57 = vpop.permute.xlu1 %287 }
  0xe4   :  { %v829_v26 = vmax.f32 %v611_v20, 0.0 }
  0xe5   :  { %v828_v27 = vmax.f32 %v606_v24, 0.0  ;;  %v1774_v28 = vpop.f32.mrb[6].mxu0 }
  0xe6   :  { %v621_v29 = vadd.f32 %v1774_v28, %v168_v60  ;;  %v615_v30 = vpop.f32.mrb[7].mxu0 }
  0xe7   :  { %v2489_v31 = vpack.c.bf16 %v829_v26, %v828_v27  ;;  %v616_v32 = vadd.f32 %v615_v30, %v163_v61  ;;  %v208_v13 = vpop.permute.xlu1 %207 }
  0xe8   :  { %v831_v33 = vmax.f32 %v621_v29, 0.0 }
  0xe9   :  { %v830_v35 = vmax.f32 %v616_v32, 0.0  ;;  %v1777_v40 = vpop.f32.mrb[8].mxu0 }
  0xea   :  { %v631_v42 = vadd.f32 %v1777_v40, %v178_v0  ;;  %v625_v43 = vpop.f32.mrb[9].mxu0 }
  0xeb   :  { %v2491_v44 = vpack.c.bf16 %v831_v33, %v830_v35  ;;  %v626_v45 = vadd.f32 %v625_v43, %v173_v1 }
  0xec   :  { %v833_v47 = vmax.f32 %v631_v42, 0.0 }
  0xed   :  { %v832_v48 = vmax.f32 %v626_v45, 0.0  ;;  %v1780_v52 = vpop.f32.mrb[10].mxu0 }
  0xee   :  { %v641_v53 = vadd.f32 %v1780_v52, %v188_v9  ;;  %v635_v56 = vpop.f32.mrb[11].mxu0 }
  0xef   :  { %v2495_v60 = vpack.c.bf16 %v833_v47, %v832_v48  ;;  %v636_v61 = vadd.f32 %v635_v56, %v183_v12 }
  0xf0   :  { %v835_v5 = vmax.f32 %v641_v53, 0.0 }
  0xf1   :  { %v834_v6 = vmax.f32 %v636_v61, 0.0  ;;  %v1783_v7 = vpop.f32.mrb[12].mxu0 }
  0xf2   :  { %v651_v0 = vadd.f32 %v1783_v7, %v198_v34  ;;  %v645_v8 = vpop.f32.mrb[13].mxu0 }
  0xf3   :  { %v2499_v10 = vpack.c.bf16 %v835_v5, %v834_v6  ;;  %v646_v1 = vadd.f32 %v645_v8, %v193_v41 }
  0xf4   :  { %v837_v11 = vmax.f32 %v651_v0, 0.0 }
  0xf5   :  { %v836_v14 = vmax.f32 %v646_v1, 0.0  ;;  %v1786_v9 = vpop.f32.mrb[14].mxu0 }
  0xf6   :  { %v661_v17 = vadd.f32 %v1786_v9, %v208_v13  ;;  %v655_v18 = vpop.f32.mrb[15].mxu0 }
  0xf7   :  { %v2501_v19 = vpack.c.bf16 %v837_v11, %v836_v14  ;;  %v656_v12 = vadd.f32 %v655_v18, %v203_v15 }
  0xf8   :  { %v839_v20 = vmax.f32 %v661_v17, 0.0 }
  0xf9   :  { %v838_v21 = vmax.f32 %v656_v12, 0.0  ;;  %v1789_v24 = vpop.f32.mrb[16].mxu0 }
  0xfa   :  { %v671_v26 = vadd.f32 %v1789_v24, %v2459_v49  ;;  %v665_v27 = vpop.f32.mrb[17].mxu0 }
  0xfb   :  { %v2504_v28 = vpack.c.bf16 %v839_v20, %v838_v21  ;;  %v666_v29 = vadd.f32 %v665_v27, %v2454_v46 }
  0xfc   :  { %v841_v30 = vmax.f32 %v671_v26, 0.0 }
  0xfd   :  { %v840_v32 = vmax.f32 %v666_v29, 0.0  ;;  %v1792_v33 = vpop.f32.mrb[18].mxu0 }
  0xfe   :  { %v681_v34 = vadd.f32 %v1792_v33, %v2461_v50  ;;  %v675_v35 = vpop.f32.mrb[19].mxu0 }
  0xff   :  { %v676_v40 = vadd.f32 %v675_v35, %v2463_v51  ;;  %v1897_v41 = vpack.c.bf16 %v841_v30, %v840_v32 }
 0x100   :  { %v843_v42 = vmax.f32 %v681_v34, 0.0 }
 0x101   :  { %v842_v43 = vmax.f32 %v676_v40, 0.0  ;;  %v1795_v45 = vpop.f32.mrb[20].mxu0  ;;  %1898 = vmatprep.subr.bf16.mxu1 %v1897_v41 }
 0x102   :  { %v691_v49 = vadd.f32 %v1795_v45, %v2465_v54  ;;  %v685_v47 = vpop.f32.mrb[21].mxu0  ;;  %1900 = vmatpush3.bf16.msra.mxu1 %v2481_v16 }
 0x103   :  { %v1901_v48 = vpack.c.bf16 %v843_v42, %v842_v43  ;;  %v686_v46 = vadd.f32 %v685_v47, %v2467_v55  ;;  %v298_v55 = vpop.permute.xlu1 %297 }
 0x104   :  { %v845_v52 = vmax.f32 %v691_v49, 0.0 }
 0x105   :  { %v844_v53 = vmax.f32 %v686_v46, 0.0  ;;  %v1798_v56 = vpop.f32.mrb[22].mxu0  ;;  %1902 = vmatprep.subr.bf16.mxu1 %v1901_v48 }
 0x106   :  { %v701_v50 = vadd.f32 %v1798_v56, %v2469_v58  ;;  %v695_v51 = vpop.f32.mrb[23].mxu0  ;;  %1904 = vmatpush3.bf16.msra.mxu1 %v2485_v23  ;;  %v293_v58 = vpop.permute.xlu0 %292 }
 0x107   :  { %v1905_v61 = vpack.c.bf16 %v845_v52, %v844_v53  ;;  %v696_v5 = vadd.f32 %v695_v51, %v2471_v59  ;;  %v308_v17 = vpop.permute.xlu1 %307 }
 0x108   :  { %v847_v6 = vmax.f32 %v701_v50, 0.0 }
 0x109   :  { %v846_v54 = vmax.f32 %v696_v5, 0.0  ;;  %v1801_v7 = vpop.f32.mrb[24].mxu0  ;;  %1906 = vmatprep.subr.bf16.mxu1 %v1905_v61 }
 0x10a   :  { %v711_v16 = vadd.f32 %v1801_v7, %v2473_v62  ;;  %v705_v0 = vpop.f32.mrb[25].mxu0  ;;  %1908 = vmatpush3.bf16.msra.mxu1 %v2489_v31  ;;  %v303_v12 = vpop.permute.xlu0 %302 }
 0x10b   :  { %v1909_v8 = vpack.c.bf16 %v847_v6, %v846_v54  ;;  %v706_v1 = vadd.f32 %v705_v0, %v2475_v63  ;;  %v318_v29 = vpop.permute.xlu1 %317  ;;  %v874_v54 = vld [vmem:[%s2628_s3 + $0x10] sm:$0xff] }
 0x10c   :  { %v849_v11 = vmax.f32 %v711_v16, 0.0 }
 0x10d   :  { %v848_v13 = vmax.f32 %v706_v1, 0.0  ;;  %v1804_v23 = vpop.f32.mrb[26].mxu0  ;;  %1910 = vmatprep.subr.bf16.mxu1 %v1909_v8 }
 0x10e   :  { %v721_v59 = vadd.f32 %v1804_v23, %v2477_v2  ;;  %v715_v14 = vpop.f32.mrb[27].mxu0  ;;  %1912 = vmatpush3.bf16.msra.mxu1 %v2491_v44 }
 0x10f   :  { %v1913_v9 = vpack.c.bf16 %v849_v11, %v848_v13  ;;  %v716_v62 = vadd.f32 %v715_v14, %v2479_v3 }
 0x110   :  { %v851_v15 = vmax.f32 %v721_v59, 0.0 }
 0x111   :  { %v850_v31 = vmax.f32 %v716_v62, 0.0  ;;  %v1807_v18 = vpop.f32.mrb[28].mxu0  ;;  %1914 = vmatprep.subr.bf16.mxu1 %v1913_v9 }
 0x112   :  { %v731_v63 = vadd.f32 %v1807_v18, %v2483_v22  ;;  %v725_v20 = vpop.f32.mrb[29].mxu0  ;;  %1916 = vmatpush3.bf16.msra.mxu1 %v2495_v60  ;;  %v313_v22 = vpop.permute.xlu0 %312 }
 0x113   :  { %v1917_v21 = vpack.c.bf16 %v851_v15, %v850_v31  ;;  %v726_v2 = vadd.f32 %v725_v20, %v2487_v25 }
 0x114   :  { %v853_v24 = vmax.f32 %v731_v63, 0.0 }
 0x115   :  { %v852_v26 = vmax.f32 %v726_v2, 0.0  ;;  %v1810_v44 = vpop.f32.mrb[30].mxu0  ;;  %1918 = vmatprep.subr.bf16.mxu1 %v1917_v21 }
 0x116   :  { %v741_v3 = vadd.f32 %v1810_v44, %v2493_v57  ;;  %v735_v27 = vpop.f32.mrb[31].mxu0  ;;  %1920 = vmatpush3.bf16.msra.mxu1 %v2499_v10  ;;  %v328_v57 = vpop.permute.xlu1 %327 }
 0x117   :  { %v1921_v30 = vpack.c.bf16 %v853_v24, %v852_v26  ;;  %v736_v32 = vadd.f32 %v735_v27, %v2497_v4  ;;  %v323_v10 = vpop.permute.xlu0 %322  ;;  %v872_v4 = vld [vmem:[%s2628_s3] sm:$0xff] }
 0x118   :  { %v855_v33 = vmax.f32 %v741_v3, 0.0 }
 0x119   :  { %v854_v34 = vmax.f32 %v736_v32, 0.0  ;;  %v1813_v60 = vpop.f32.mrb[32].mxu0  ;;  %1922 = vmatprep.subr.bf16.mxu1 %v1921_v30 }
 0x11a   :  { %v751_v35 = vadd.f32 %v1813_v60, %v298_v55  ;;  %v745_v25 = vpop.f32.mrb[33].mxu0  ;;  %1924 = vmatpush3.bf16.msra.mxu1 %v2501_v19  ;;  %v876_v19 = vld [vmem:[%s2628_s3 + $0x20] sm:$0x1]  ;;  %v338_v61 = vpop.permute.xlu1 %337 }
 0x11b   :  { %v1925_v40 = vpack.c.bf16 %v855_v33, %v854_v34  ;;  %v746_v41 = vadd.f32 %v745_v25, %v293_v58  ;;  %v333_v7 = vpop.permute.xlu0 %332 }
 0x11c   :  { %v857_v42 = vmax.f32 %v751_v35, 0.0 }
 0x11d   :  { %v856_v43 = vmax.f32 %v746_v41, 0.0  ;;  %v1816_v45 = vpop.f32.mrb[34].mxu0  ;;  %1926 = vmatprep.subr.bf16.mxu1 %v1925_v40 }
 0x11e   :  { %v761_v49 = vadd.f32 %v1816_v45, %v308_v17  ;;  %v755_v47 = vpop.f32.mrb[35].mxu0  ;;  %1928 = vmatpush3.bf16.msra.mxu1 %v2504_v28  ;;  %v875_v28 = vld [vmem:[%s2628_s3 + $0x18] sm:$0x1]  ;;  %v348_v23 = vpop.permute.xlu1 %347 }
 0x11f   :  { %v1929_v48 = vpack.c.bf16 %v857_v42, %v856_v43  ;;  %v756_v46 = vadd.f32 %v755_v47, %v303_v12  ;;  %v343_v9 = vpop.permute.xlu0 %342  ;;  %v877_v47 = vld [vmem:[%s2628_s3 + $0x28] sm:$0x1] }
 0x120   :  { %v859_v52 = vmax.f32 %v761_v49, 0.0 }
 0x121   :  { %v858_v53 = vmax.f32 %v756_v46, 0.0  ;;  %v1819_v56 = vpop.f32.mrb[36].mxu0  ;;  %955 = vmatmul.mubr.f32.vlgmr.msra.gmra.mrb[0].mxu1 %v872_v4  ;;  %1930 = vmatprep.subr.bf16.mxu1 %v1929_v48 }
 0x122   :  { %v771_v50 = vadd.f32 %v1819_v56, %v318_v29  ;;  %v765_v51 = vpop.f32.mrb[37].mxu0  ;;  %1932 = vmatpush3.bf16.msra.mxu1 %v1929_v48  ;;  %959 = vmatprep.mubr.f32.mxu1 %v876_v19  ;;  %v358_v2 = vpop.permute.xlu1 %357 }
 0x123   :  { %v1933_v5 = vpack.c.bf16 %v859_v52, %v858_v53  ;;  %v766_v6 = vadd.f32 %v765_v51, %v313_v22  ;;  %v353_v44 = vpop.permute.xlu0 %352 }
 0x124   :  { %v861_v16 = vmax.f32 %v771_v50, 0.0 }
 0x125   :  { %v860_v0 = vmax.f32 %v766_v6, 0.0  ;;  %v1822_v55 = vpop.f32.mrb[38].mxu0  ;;  %960 = vmatmul.mubr.f32.gmra.mrb[2].mxu1 %v875_v28  ;;  %1934 = vmatprep.subr.bf16.mxu1 %v1933_v5 }
 0x126   :  { %v781_v8 = vadd.f32 %v1822_v55, %v328_v57  ;;  %v775_v1 = vpop.f32.mrb[39].mxu0  ;;  %1936 = vmatpush3.bf16.msra.mxu1 %v1933_v5  ;;  %1867 = vmatprep.mubr.f32.mxu1 %v874_v54  ;;  %v368_v60 = vpop.permute.xlu1 %367 }
 0x127   :  { %v1937_v58 = vpack.c.bf16 %v861_v16, %v860_v0  ;;  %v776_v11 = vadd.f32 %v775_v1, %v323_v10  ;;  %v363_v40 = vpop.permute.xlu0 %362 }
 0x128   :  { %v863_v13 = vmax.f32 %v781_v8, 0.0 }
 0x129   :  { %v862_v59 = vmax.f32 %v776_v11, 0.0  ;;  %v1825_v14 = vpop.f32.mrb[40].mxu0  ;;  %1938 = vmatprep.subr.bf16.mxu1 %v1937_v58 }
 0x12a   :  { %v791_v62 = vadd.f32 %v1825_v14, %v338_v61  ;;  %v785_v15 = vpop.f32.mrb[41].mxu0  ;;  %1940 = vmatpush3.bf16.msra.mxu1 %v1937_v58  ;;  %v888_v51 = vpop.permute.xlu1 %887 }
 0x12b   :  { %v1941_v17 = vpack.c.bf16 %v863_v13, %v862_v59  ;;  %v786_v31 = vadd.f32 %v785_v15, %v333_v7  ;;  %v883_v4 = vpop.permute.xlu0 %882 }
 0x12c   :  { %v865_v18 = vmax.f32 %v791_v62, 0.0 }
 0x12d   :  { %v864_v12 = vmax.f32 %v786_v31, 0.0  ;;  %v1828_v63 = vpop.f32.mrb[42].mxu0  ;;  %1942 = vmatprep.subr.bf16.mxu1 %v1941_v17  ;;  %v1061_v31 = vlaneseq }
 0x12e   :  { %v801_v20 = vadd.f32 %v1828_v63, %v348_v23  ;;  %v795_v21 = vpop.f32.mrb[43].mxu0  ;;  %1944 = vmatpush3.bf16.msra.mxu1 %v1941_v17 }
 0x12f   :  { %v1945_v24 = vpack.c.bf16 %v865_v18, %v864_v12  ;;  %v796_v26 = vadd.f32 %v795_v21, %v343_v9  ;;  %v1219_v48 = vpop.permute.xlu0 %1218 }
 0x130   :  { %v867_v3 = vmax.f32 %v801_v20, 0.0  ;;  %v2554_v20 = vshrl.u32 %v1061_v31, 7 }
 0x131   :  { %v866_v27 = vmax.f32 %v796_v26, 0.0  ;;  %v1831_v29 = vpop.f32.mrb[44].mxu0  ;;  %1946 = vmatprep.subr.bf16.mxu1 %v1945_v24 }
 0x132   :  { %v811_v30 = vadd.f32 %v1831_v29, %v358_v2  ;;  %v805_v32 = vpop.f32.mrb[45].mxu0  ;;  %1948 = vmatpush3.bf16.msra.mxu1 %v1945_v24 }
 0x133   :  { %v1949_v22 = vpack.c.bf16 %v867_v3, %v866_v27  ;;  %v806_v33 = vadd.f32 %v805_v32, %v353_v44  ;;  %v2557_v3 = vsub.s32 0, %v2554_v20 }
 0x134   :  { %v869_v34 = vmax.f32 %v811_v30, 0.0 }
 0x135   :  { %v868_v35 = vmax.f32 %v806_v33, 0.0  ;;  %v1834_v25 = vpop.f32.mrb[46].mxu0  ;;  %1950 = vmatprep.subr.bf16.mxu1 %v1949_v22 }
 0x136   :  { %v821_v41 = vadd.f32 %v1834_v25, %v368_v60  ;;  %v815_v42 = vpop.f32.mrb[47].mxu0  ;;  %1952 = vmatpush3.bf16.msra.mxu1 %v1949_v22 }
 0x137   :  { %v1953_v57 = vpack.c.bf16 %v869_v34, %v868_v35  ;;  %v816_v43 = vadd.f32 %v815_v42, %v363_v40 }
 0x138   :  { %v871_v45 = vmax.f32 %v821_v41, 0.0 }
 0x139   :  { %v870_v10 = vmax.f32 %v816_v43, 0.0  ;;  %1954 = vmatprep.subr.bf16.mxu1 %v1953_v57 }
 0x13a   :  { %1956 = vmatpush3.bf16.msra.mxu1 %v1953_v57 }
 0x13b   :  { %v1957_v49 = vpack.c.bf16 %v871_v45, %v870_v10 }
 0x13d   :  { %1958 = vmatprep.subr.bf16.mxu1 %v1957_v49 }
 0x13e   :  { %1960 = vmatpush3.bf16.msra.mxu1 %v1957_v49 }
 0x141   :  { %1868 = vmatmul.mubr.f32.vlgmr.msra.gmra.mrb[4].mxu1 %v877_v47 }
 0x142   :  { %1872 = vmatprep.mubr.msk.f32.mxu1 %vm1226_vm2, %v1219_v48 }
 0x1f4   :  { %v1722_v46 = vpop.f32.mrb[0].mxu1 }
 0x1f5   :  { %v1723_v19 = vpop.f32.mrb[1].mxu1 }
 0x1f6   :  { %v1724_v52 = vadd.f32 %v1723_v19, %v1722_v46  ;;  %v1119_v19 = vsub.s32 3, %v2554_v20 }
 0x1f8   :  { %v1725_v53 = vpop.f32.mrb[2].mxu1  ;;  %v957_v5 = vadd.f32 %v1724_v52, %v883_v4 }
 0x1f9   :  { %v1726_v56 = vpop.f32.mrb[3].mxu1 }
 0x1fa   :  { %v1727_v50 = vadd.f32 %v1726_v56, %v1725_v53 }
 0x1fc   :  { %v962_v28 = vadd.f32 %v1727_v50, %v888_v51 }
 0x214   :  { %v1869_v61 = vpop.f32.mrb[4].mxu1 }
 0x215   :  { %v1037_v6 = vadd.f32 %v1869_v61, %v962_v28  ;;  %v1031_v54 = vpop.f32.mrb[5].mxu1 }
 0x216   :  { %v2545_v7 = vadd.f32 %v1031_v54, %v957_v5 }
 0x217   :  { %v1081_v16 = vrot.slane %v1037_v6, 6  ;;  %v1104_v0 = vrot.slane %v1037_v6, 3 }
 0x218   :  { %v1040_v55 = vmul.f32 %v2545_v7, %v2545_v7  ;;  %v1050_v8 = vrot.slane %v2545_v7, 3  ;;  %v1080_v1 = vrot.slane %v2545_v7, 6 }
 0x21a   :  { %v1042_v58 = vrot.slane %v1040_v55, 1  ;;  %v1082_v11 = vsel %vm1079_vm3, %v1080_v1, %v1081_v16  ;;  %v1105_v23 = vsel %vm1103_vm4, %v1050_v8, %v1104_v0  ;;  %v1045_v14 = vrot.slane %v1040_v55, 2 }
 0x21b   :  { %v1084_v13 = vmul.f32 %v1082_v11, %v2545_v7  ;;  %v1052_v9 = vmul.f32 %v1050_v8, %v2545_v7  ;;  %v1194_v8 = vsub.s32 4, %v2554_v20  ;;  %v1167_v1 = vsub.s32 1, %v2554_v20 }
 0x21c   :  { %v1044_v59 = vadd.f32 %v1042_v58, %v1040_v55 }
 0x21d   :  { %v1054_v15 = vrot.slane %v1052_v9, 1  ;;  %v1086_v17 = vrot.slane %v1084_v13, 1  ;;  %v1057_v63 = vrot.slane %v1052_v9, 2  ;;  %v1089_v21 = vrot.slane %v1084_v13, 2 }
 0x21e   :  { %v1047_v62 = vadd.f32 %v1045_v14, %v1044_v59  ;;  %v1152_v59 = vsub.s32 6, %v2554_v20  ;;  %v1203_v14 = vsub.s32 5, %v2554_v20 }
 0x21f   :  { %v1056_v18 = vadd.f32 %v1054_v15, %v1052_v9  ;;  %v1088_v12 = vadd.f32 %v1086_v17, %v1084_v13  ;;  %v1989_v13 = vld [vmem:[%s2625_s0] sm:$0x3f]  ;;  %v1176_v9 = vsub.s32 2, %v2554_v20 }
 0x220   :  { %1979 = vrcp.f32 %v1047_v62  ;;  %v1168_v15 = vrot.slane %v1989_v13, %v1167_v1 }
 0x221   :  { %v1059_v2 = vadd.f32 %v1057_v63, %v1056_v18  ;;  %v1091_v24 = vadd.f32 %v1089_v21, %v1088_v12  ;;  %v1204_v12 = vrot.slane %v1989_v13, %v1203_v14  ;;  %v1177_v63 = vrot.slane %v1989_v13, %v1176_v9 }
 0x22a   :  { %v1980_v26 = vpop.eup %1979 }
 0x22b   :  { %v1060_v44 = vmul.f32 %v1980_v26, %v1059_v2  ;;  %v1092_v27 = vmul.f32 %v1980_v26, %v1091_v24  ;;  %v1190_v2 = vrot.slane %v1989_v13, %v1119_v19 }
 0x22d   :  { %v1064_v29 = vrot.slane %v1060_v44, %v2557_v3  ;;  %v1096_v30 = vrot.slane %v1092_v27, %v2557_v3  ;;  %v1163_v27 = vrot.slane %v1989_v13, %v2557_v3 }
 0x22f   :  { %v1065_v32 = vmul.f32 %v1064_v29, %v2545_v7  ;;  %v1097_v22 = vmul.f32 %v1096_v30, %v2545_v7 }
 0x231   :  { %v1067_v33 = vrot.slane %v1065_v32, 5  ;;  %v1099_v34 = vrot.slane %v1097_v22, 2 }
 0x233   :  { %v1069_v60 = vsub.f32 %v2545_v7, %v1067_v33  ;;  %v1101_v35 = vsub.f32 %v2545_v7, %v1099_v34  ;;  %v1102_v25 = vsub.f32 %v1037_v6, %v1099_v34 }
 0x235   :  { %v1070_v40 = vmul.f32 %v1069_v60, %v1069_v60  ;;  %v1107_v41 = vmul.f32 %v1105_v23, %v1069_v60  ;;  %v1195_v23 = vrot.slane %v1989_v13, %v1194_v8 }
 0x237   :  { %v1072_v42 = vrot.slane %v1070_v40, 1  ;;  %v1075_v43 = vrot.slane %v1070_v40, 2  ;;  %v1109_v10 = vrot.slane %v1107_v41, 1  ;;  %v1112_v47 = vrot.slane %v1107_v41, 2 }
 0x239   :  { %v1074_v57 = vadd.f32 %v1072_v42, %v1070_v40  ;;  %v1111_v49 = vadd.f32 %v1109_v10, %v1107_v41 }
 0x23b   :  { %v1077_v45 = vadd.f32 %v1075_v43, %v1074_v57  ;;  %v1114_v4 = vadd.f32 %v1112_v47, %v1111_v49  ;;  %v1223_v49 = vpop.permute.xlu0 %1222 }
 0x23d   :  { %1981 = vrcp.f32 %v1077_v45 }
 0x23e   :  { %1983 = vrsqrt.f32 %v1077_v45  ;;  %v1221_v45 = vpop.permute.xlu1 %1220 }
 0x23f   :  { %1985 = vrsqrt.f32 %v1047_v62 }
 0x242   :  { %v1225_v47 = vpop.permute.xlu1 %1224 }
 0x247   :  { %v1982_v48 = vpop.eup %1981 }
 0x248   :  { %v1116_v46 = vmul.f32 %v1982_v48, %v1114_v4  ;;  %v1984_v0 = vpop.eup %1983  ;;  %v2016_v4 = vmov 0.0|0.0   ;;  %v2018_v48 = vmov 0.0  }
 0x249   :  { %v1137_v55 = vrot.slane %v1984_v0, %v1119_v19  ;;  %v1986_v58 = vpop.eup %1985 }
 0x24a   :  { %v1120_v52 = vrot.slane %v1116_v46, %v1119_v19  ;;  %v1131_v62 = vrot.slane %v1986_v58, %v2557_v3  ;;  %v1432_v46 = vpop.permute.xlu1 %1431  ;;  %v1427_v19 = vpop.permute.xlu0 %1426 }
 0x24b   :  { %v2568_v11 = vmul.f32 %v1137_v55, %v1069_v60  ;;  %v1452_v55 = vld [vmem:[%s2632_s7] sm:$0x7]  ;;  %s2019_s7 = smov [#allocation2]  }
 0x24c   :  { %v1121_v53 = vmul.f32 %v1120_v52, %v1069_v60  ;;  %v2579_v21 = vmul.f32 %v1131_v62, %v2545_v7  ;;  %s1573_s21 = sshll.u32 %s2019_s7, 4  ;;  %s1574_s21 = int_to_ptr.vmem [resolvable:$true] %s1573_s21 }
 0x24d   :  { %v1196_v31 = vmul.f32 %v1195_v23, %v2568_v11  ;;  %v1169_v24 = vmul.f32 %v1168_v15, %v2568_v11  ;;  %s1990_s22 = scalar_lea.vmem %s1574_s21, 64  ;;  %p1995_p1 = scmp.lt.s32.totalorder %s1574_s21, %s1574_s21 }
 0x24e   :  { %v1123_v56 = vrot.slane %v1121_v53, 5  ;;  %v1191_v7 = vmul.f32 %v1190_v2, %v2579_v21  ;;  %v1164_v41 = vmul.f32 %v1163_v27, %v2579_v21  ;;  %p1991_p0 = scmp.ne.s32.totalorder %s1574_s21, %s1990_s22  ;;  %p1996_p2 = scmp.lt.s32.totalorder %s1990_s22, %s1990_s22 }
 0x24f   :  { %v1198_v20 = vrot.slane %v1196_v31, 3  ;;  %v1171_v33 = vrot.slane %v1169_v24, 3 }
 0x250   :  { %v1125_v50 = vsub.f32 %v1101_v35, %v1123_v56  ;;  %v1126_v51 = vsub.f32 %v1102_v25, %v1123_v56  ;;  %p1997_p3 = por %p1996_p2, %p1995_p1 }
 0x251   :  { %v1200_v40 = vadd.f32 %v1198_v20, %v1191_v7  ;;  %v1173_v43 = vadd.f32 %v1171_v33, %v1164_v41 }
 0x252   :  { %v1139_v28 = vmul.f32 %v1125_v50, %v1125_v50  ;;  %v1140_v61 = vmul.f32 %v1126_v51, %v1126_v51  ;;  %p1998_p4 = pnand %p1997_p3, %p1991_p0 }
 0x254   :  { %v1142_v5 = vrot.slane %v1139_v28, 1  ;;  %v1146_v54 = vrot.slane %v1140_v61, 2  ;;  %v1437_v61 = vpop.permute.xlu0 %1436 }
 0x256   :  { %v1144_v6 = vadd.f32 %v1142_v5, %v1139_v28 }
 0x258   :  { %v1148_v16 = vadd.f32 %v1146_v54, %v1144_v6  ;;  %v1457_v8 = vpop.permute.xlu0 %1456 }
 0x25a   :  { %1987 = vrsqrt.f32 %v1148_v16 }
 0x264   :  { %v1988_v17 = vpop.eup %1987 }
 0x265   :  { %v1153_v18 = vrot.slane %v1988_v17, %v1152_v59 }
 0x267   :  { %v2582_v26 = vmul.f32 %v1153_v18, %v1125_v50  ;;  %v2584_v44 = vmul.f32 %v1153_v18, %v1126_v51  ;;  %v1442_v51 = vpop.permute.xlu1 %1441 }
 0x269   :  { %v1205_v29 = vmul.f32 %v1204_v12, %v2582_v26  ;;  %v1206_v30 = vmul.f32 %v1204_v12, %v2584_v44  ;;  %v1178_v32 = vmul.f32 %v1177_v63, %v2582_v26  ;;  %v1179_v22 = vmul.f32 %v1177_v63, %v2584_v44 }
 0x26b   :  { %v1209_v34 = vrot.slane %v1205_v29, 6  ;;  %v1210_v60 = vrot.slane %v1206_v30, 6  ;;  %v1182_v35 = vrot.slane %v1178_v32, 6  ;;  %v1183_v25 = vrot.slane %v1179_v22, 6 }
 0x26d   :  { %v1211_v3 = vsel %vm1079_vm3, %v1209_v34, %v1210_v60  ;;  %v1184_v42 = vsel %vm1079_vm3, %v1182_v35, %v1183_v25 }
 0x26e   :  { %v1213_v57 = vadd.f32 %v1211_v3, %v1200_v40  ;;  %v1186_v10 = vadd.f32 %v1184_v42, %v1173_v43 }
 0x270   :  { %1870 = vmatprep.subr.msk.mxu1 %vm1235_vm5, %v1213_v57 }
 0x271   :  { %1871 = vmatpush3.msk.msra.mxu1 %vm1235_vm5, %v1213_v57 }
 0x272   :  { %1873 = vmatmul.mubr.msk.f32.vlgmr.msra.gmra.mrb[6].mxu1 %vm1226_vm2, %v1221_v45  ;;  %1878 = vmatprep.subr.msk.mxu1 %vm1235_vm5, %v1186_v10 }
 0x273   :  { %1879 = vmatpush3.msk.msra.mxu1 %vm1235_vm5, %v1186_v10  ;;  %1875 = vmatprep.mubr.msk.f32.mxu1 %vm1226_vm2, %v1223_v49 }
 0x274   :  { %1961 = vmatprep.subr.bf16.mxu1 %v2016_v4 }
 0x276   :  { %1876 = vmatmul.mubr.msk.f32.gmra.mrb[8].mxu1 %vm1226_vm2, %v1225_v47 }
 0x277   :  { %1880 = vmatprep.mubr.msk.f32.mxu1 %vm1226_vm2, %v2418_v36 }
 0x27a   :  { %1881 = vmatmul.mubr.msk.f32.vlgmr.msra.gmra.mrb[6].mxu1 %vm1226_vm2, %v2423_v37 }
 0x27b   :  { %1883 = vmatprep.mubr.msk.f32.mxu1 %vm1226_vm2, %v2430_v38 }
 0x27e   :  { %1884 = vmatmul.mubr.msk.f32.gmra.mrb[8].mxu1 %vm1226_vm2, %v2435_v39 }
 0x27f   :  { %1894 = vmatprep.mubr.msk.f32.mxu1 %vm2017_vm6, %v2018_v48 }
 0x34d   :  { %v1882_v52 = vpop.f32.mrb[6].mxu1 }
 0x34e   :  { %v1445_v53 = vadd.f32 %v1882_v52, %v1432_v46  ;;  %v1401_v56 = vpop.f32.mrb[7].mxu1 }
 0x34f   :  { %v1444_v36 = vadd.f32 %v1427_v19, %v1401_v56 }
 0x350   :  { %v1449_v50 = vmax.f32 %v1445_v53, 0.0 }
 0x351   :  { %v1448_v37 = vmax.f32 %v1444_v36, 0.0  ;;  %v1885_v28 = vpop.f32.mrb[8].mxu1 }
 0x352   :  { %v1447_v38 = vadd.f32 %v1885_v28, %v1442_v51  ;;  %v1411_v5 = vpop.f32.mrb[9].mxu1 }
 0x353   :  { %v1962_v6 = vpack.c.bf16 %v1449_v50, %v1448_v37  ;;  %v1446_v39 = vadd.f32 %v1437_v61, %v1411_v5 }
 0x354   :  { %v1451_v54 = vmax.f32 %v1447_v38, 0.0 }
 0x355   :  { %v1450_v16 = vmax.f32 %v1446_v39, 0.0  ;;  %1963 = vmatpush3.bf16.msra.mxu1 %v1962_v6 }
 0x356   :  { %1964 = vmatprep.subr.bf16.mxu1 %v2016_v4 }
 0x357   :  { %v1965_v0 = vpack.c.bf16 %v1451_v54, %v1450_v16 }
 0x359   :  { %1966 = vmatpush3.bf16.msra.mxu1 %v1965_v0 }
 0x35c   :  { %1895 = vmatmul.mubr.msk.f32.vlgmr.msra.gmra.mrb[10].mxu1 %vm1459_vm7, %v1452_v55 }
 0x42f   :  { %v1529_v1 = vpop.f32.mrb[10].mxu1 }
 0x430   :  { %v1530_v58 = vadd.f32 %v1529_v1, %v1457_v8  ;;  %v1896_v13 = vpop.f32.mrb[11].mxu1 }
 0x432   :  { %v1533_v23 = vmul.f32 %v1530_v58, %v2579_v21  ;;  %v1543_v59 = vrot.slane %v1530_v58, 5  ;;  %v1554_v14 = vrot.slane %v1530_v58, 2 }
 0x434   :  { %v1535_v9 = vrot.slane %v1533_v23, 1  ;;  %v1545_v62 = vmul.f32 %v1543_v59, %v2568_v11  ;;  %v1556_v15 = vmul.f32 %v1554_v14, %v2582_v26  ;;  %v1557_v17 = vmul.f32 %v1554_v14, %v2584_v44 }
 0x435   :  { %v1538_v12 = vrot.slane %v1533_v23, 2 }
 0x436   :  { %v1559_v31 = vrot.slane %v1556_v15, 1  ;;  %v1537_v18 = vadd.f32 %v1535_v9, %v1533_v23  ;;  %v1547_v63 = vrot.slane %v1545_v62, 1  ;;  %v1563_v2 = vrot.slane %v1557_v17, 2 }
 0x437   :  { %v1550_v27 = vrot.slane %v1545_v62, 2 }
 0x438   :  { %v1540_v24 = vadd.f32 %v1538_v12, %v1537_v18  ;;  %v1549_v20 = vadd.f32 %v1547_v63, %v1545_v62  ;;  %v1561_v21 = vadd.f32 %v1559_v31, %v1556_v15 }
 0x43a   :  { %1541 = vst [vmem:[#allocation2] sm:$0x1] %v1540_v24  ;;  %v1552_v29 = vadd.f32 %v1550_v27, %v1549_v20  ;;  %v1565_v30 = vadd.f32 %v1563_v2, %v1561_v21 }
 0x43c   :  { %1553 = vst [vmem:[#allocation2 - $0x2] sm:$0x8] %v1552_v29  ;;  %1566 = vst [vmem:[#allocation2 - $0x4] sm:$0x40] %v1565_v30 }
 0x43d   :  { %2001 = shalt.err (!%p1998_p4)
}
 0x43e   :  { %s2002_s25 = scalar_lea.hbm %s2634_s9, 64 }
 0x43f   :  { %p2003_p5 = scmp.ne.s32.totalorder %s2634_s9, %s2002_s25  ;;  %p2006_p6 = scmp.lt.u32.totalorder %s2002_s25, %s2634_s9 }
 0x441   :  { %p2008_p7 = pnand %p2006_p6, %p2003_p5 }
 0x443   :  { %2011 = shalt.err (!%p2008_p7)
}
 0x444   :  { %1576 = dma.vmem_to_hbm [thread:$0]  %s1574_s21, 64, %s2634_s9, [#allocation3]  }
 0x445   :  { %2012 = dma.done.wait [#allocation3], 64  }
 0x446   :  { %2013 = vsyncadd [#allocation3], 4294967232 }
 0x447   :  { %1580 = vsyncpa [#allocation3], 1 }

</bundles_post_ra>
